<compile_context>
chip_gen: v7x
topology: tpu7x:2x2x1
jax: 0.10.0
libtpu: 0.0.40
codegen_flags: <defaults>
</compile_context>

<pallas_src>
import functools
import math

import jax
import jax.numpy as jnp
from jax.experimental import pallas as pl
from jax.experimental.pallas import tpu as pltpu

# ---------------- config (small, DistilBERT-shaped) ----------------
VOCAB = 1000        # synthetic vocab (real: 30522) -- weights are synthetic
MAX_POS = 64
D_MODEL = 768       # must stay 768: the head hardcodes Linear(768, 768) / Linear(768, 4)
N_HEADS = 12
HEAD_DIM = D_MODEL // N_HEADS
D_FF = 3072
N_LAYERS = 2        # reduced from 6 for a small runnable example
N_CLASSES = 4
LN_EPS = 1e-12

# Above v5e's 16 MiB scoped default, far below physical VMEM on every
# generation; largest double-buffered bf16 weight block (FF2) is ~9 MiB.
VMEM_LIMIT = 32 * 1024 * 1024


def _pick_tile(dim, cap, candidates):
    """Largest lane-aligned tile <= cap that divides dim (or the full dim)."""
    if dim <= cap:
        return dim
    for t in candidates:
        if t <= cap and dim % t == 0:
            return t
    return dim


# ---------------- fused Linear (+bias, +act, +residual, +LayerNorm) ----------------
def _linear_kernel(act, has_res, has_ln, *refs):
    refs = list(refs)
    x_ref = refs.pop(0)
    w_ref = refs.pop(0)
    b_ref = refs.pop(0)
    res_ref = refs.pop(0) if has_res else None
    g_ref = refs.pop(0) if has_ln else None
    beta_ref = refs.pop(0) if has_ln else None
    o_ref = refs.pop(0)

    # bf16 operands on the MXU, f32 accumulation.
    y = jnp.dot(x_ref[...].astype(jnp.bfloat16),
                w_ref[...].astype(jnp.bfloat16),
                preferred_element_type=jnp.float32)
    y = y + b_ref[...].astype(jnp.float32)
    if act == "relu":
        y = jnp.maximum(y, 0.0)
    elif act == "gelu":
        # tanh-approximate GELU (HF DistilBERT uses erf-based gelu).
        # TODO(synk): switch to erf-based gelu if bit-level parity with HF is required.
        c = jnp.float32(math.sqrt(2.0 / math.pi))
        y = 0.5 * y * (1.0 + jnp.tanh(c * (y + 0.044715 * y * y * y)))
    if has_res:
        y = y + res_ref[...].astype(jnp.float32)
    if has_ln:
        mean = jnp.mean(y, axis=-1, keepdims=True)
        var = jnp.mean((y - mean) ** 2, axis=-1, keepdims=True)
        y = (y - mean) * jax.lax.rsqrt(var + LN_EPS)
        y = y * g_ref[...].astype(jnp.float32) + beta_ref[...].astype(jnp.float32)
    o_ref[...] = y.astype(o_ref.dtype)


def linear(x, w, b, act=None, residual=None, ln=None, out_dtype=jnp.bfloat16):
    """y = act(x @ w + b);  if ln: y = LayerNorm(y + residual) over the last dim.

    x: (M, K) float, w: (K, N) bf16, b: (N,) f32, residual: (M, N) or None,
    ln: (gamma, beta) each (N,) f32 or None.  Returns (M, N) out_dtype.

    K always fits a single block here (<= 3072), so there is no K grid axis
    and no accumulator scratch.
    """
    M, K = x.shape
    _, N = w.shape
    assert K <= 3072, "single-K-block linear; all DistilBERT matmuls satisfy this"
    tk = K
    if ln is not None:
        tn = N                       # LayerNorm needs the full hidden dim in-block
    else:
        tn = _pick_tile(N, 1536, (1536, 1280, 1152, 1024, 896, 768, 640, 512,
                                  384, 256, 128))
    nn = N // tn
    # When N isn't tiled (LN-fused case, nn=1), split rows instead so v7x's
    # second TensorCore gets work; LayerNorm is per-row so this is exact.
    if nn == 1 and M >= 16 and M % 16 == 0:
        tm = M // 2
    else:
        tm = M
    nm = M // tm

    in_specs = [
        pl.BlockSpec((tm, tk), lambda m, n: (m, 0)),
        pl.BlockSpec((tk, tn), lambda m, n: (0, n)),
        pl.BlockSpec((1, tn), lambda m, n: (0, n)),
    ]
    inputs = [x, w, b.reshape(1, N)]
    if residual is not None:
        in_specs.append(pl.BlockSpec((tm, tn), lambda m, n: (m, n)))
        inputs.append(residual)
    if ln is not None:
        g, beta = ln
        in_specs += [pl.BlockSpec((1, tn), lambda m, n: (0, n)),
                     pl.BlockSpec((1, tn), lambda m, n: (0, n))]
        inputs += [g.reshape(1, N), beta.reshape(1, N)]

    return pl.pallas_call(
        functools.partial(_linear_kernel, act, residual is not None, ln is not None),
        out_shape=jax.ShapeDtypeStruct((M, N), out_dtype),
        grid_spec=pltpu.PrefetchScalarGridSpec(
            num_scalar_prefetch=0,
            grid=(nm, nn),
            in_specs=in_specs,
            out_specs=pl.BlockSpec((tm, tn), lambda m, n: (m, n)),
        ),
        compiler_params=pltpu.CompilerParams(
            dimension_semantics=("parallel", "parallel"),
            vmem_limit_bytes=VMEM_LIMIT),
    )(*inputs)


# ---------------- fused attention: one grid step per batch element ----------------
def _attn_kernel(scale, qkv_ref, m_ref, o_ref):
    """softmax(q k^T * scale + mask) v for all heads of one batch element.

    qkv_ref: (S, 3*D) bf16 slab [Q | K | V] straight from the fused projection;
    m_ref:   (1, S) f32 additive key mask;
    o_ref:   (S, D) bf16, heads merged -> one lane-dense store.
    """
    qkv = qkv_ref[...]
    mask = m_ref[...].astype(jnp.float32)            # broadcasts over query rows
    ctx = []
    for h in range(N_HEADS):                          # tiny S: unrolled per-head
        lo = h * HEAD_DIM
        q = qkv[:, lo:lo + HEAD_DIM]
        k = qkv[:, D_MODEL + lo:D_MODEL + lo + HEAD_DIM]
        v = qkv[:, 2 * D_MODEL + lo:2 * D_MODEL + lo + HEAD_DIM]
        s = jax.lax.dot_general(q, k, (((1,), (1,)), ((), ())),
                                preferred_element_type=jnp.float32) * scale
        s = s + mask
        s = s - jnp.max(s, axis=-1, keepdims=True)
        p = jnp.exp(s)
        p = p * pl.reciprocal(jnp.sum(p, axis=-1, keepdims=True), approx=True)
        c = jnp.dot(p.astype(jnp.bfloat16), v, preferred_element_type=jnp.float32)
        ctx.append(c.astype(jnp.bfloat16))
    # head-merge in-vreg, single lane-dense (S, 768) store
    o_ref[...] = jnp.concatenate(ctx, axis=-1).astype(o_ref.dtype)


def attention(qkv, add_mask):
    """qkv: (B, S, 3*D) bf16; add_mask: (B, 1, S) f32 additive -> (B, S, D) bf16."""
    B, S, _ = qkv.shape
    scale = 1.0 / math.sqrt(HEAD_DIM)
    return pl.pallas_call(
        functools.partial(_attn_kernel, scale),
        out_shape=jax.ShapeDtypeStruct((B, S, D_MODEL), jnp.bfloat16),
        grid_spec=pltpu.PrefetchScalarGridSpec(
            num_scalar_prefetch=0,
            grid=(B,),
            in_specs=[
                pl.BlockSpec((None, S, 3 * D_MODEL), lambda b: (b, 0, 0)),
                pl.BlockSpec((None, 1, S), lambda b: (b, 0, 0)),
            ],
            out_specs=pl.BlockSpec((None, S, D_MODEL), lambda b: (b, 0, 0)),
        ),
        compiler_params=pltpu.CompilerParams(
            dimension_semantics=("parallel",),
            vmem_limit_bytes=VMEM_LIMIT),
    )(qkv, add_mask)


# ---------------- standalone LayerNorm (embeddings only; others are fused) ----------------
def _ln_kernel(eps, x_ref, g_ref, b_ref, o_ref):
    x = x_ref[...].astype(jnp.float32)
    mean = jnp.mean(x, axis=-1, keepdims=True)
    var = jnp.mean((x - mean) ** 2, axis=-1, keepdims=True)
    y = (x - mean) * jax.lax.rsqrt(var + eps)
    o_ref[...] = (y * g_ref[...] + b_ref[...]).astype(o_ref.dtype)


def layernorm(x, g, b, eps=LN_EPS, out_dtype=jnp.bfloat16):
    M, N = x.shape
    return pl.pallas_call(
        functools.partial(_ln_kernel, eps),
        out_shape=jax.ShapeDtypeStruct((M, N), out_dtype),
        grid_spec=pltpu.PrefetchScalarGridSpec(
            num_scalar_prefetch=0,
            grid=(1,),
            in_specs=[
                pl.BlockSpec((M, N), lambda i: (0, 0)),
                pl.BlockSpec((1, N), lambda i: (0, 0)),
                pl.BlockSpec((1, N), lambda i: (0, 0)),
            ],
            out_specs=pl.BlockSpec((M, N), lambda i: (0, 0)),
        ),
        compiler_params=pltpu.CompilerParams(vmem_limit_bytes=VMEM_LIMIT),
    )(x, g.reshape(1, N), b.reshape(1, N))


# ---------------- fused classification head: relu(x@w1+b1) @ w2 + b2 ----------------
def _head_kernel(x_ref, w1_ref, b1_ref, w2_ref, b2_ref, o_ref):
    h = jnp.dot(x_ref[...].astype(jnp.bfloat16), w1_ref[...],
                preferred_element_type=jnp.float32)
    h = jnp.maximum(h + b1_ref[...].astype(jnp.float32), 0.0)
    # nn.Dropout(0.3) is identity at inference
    logits = jnp.dot(h.astype(jnp.bfloat16), w2_ref[...],
                     preferred_element_type=jnp.float32)
    o_ref[...] = (logits + b2_ref[...].astype(jnp.float32)).astype(o_ref.dtype)


def classifier_head(x, w1, b1, w2, b2):
    B, D = x.shape
    N = w2.shape[1]
    return pl.pallas_call(
        _head_kernel,
        out_shape=jax.ShapeDtypeStruct((B, N), jnp.float32),
        grid_spec=pltpu.PrefetchScalarGridSpec(
            num_scalar_prefetch=0,
            grid=(1,),
            in_specs=[
                pl.BlockSpec((B, D), lambda i: (0, 0)),
                pl.BlockSpec((D, D), lambda i: (0, 0)),
                pl.BlockSpec((1, D), lambda i: (0, 0)),
                pl.BlockSpec((D, N), lambda i: (0, 0)),
                pl.BlockSpec((1, N), lambda i: (0, 0)),
            ],
            out_specs=pl.BlockSpec((B, N), lambda i: (0, 0)),
        ),
        compiler_params=pltpu.CompilerParams(vmem_limit_bytes=VMEM_LIMIT),
    )(x, w1, b1.reshape(1, D), w2, b2.reshape(1, N))


# ---------------- model (glue around the kernels) ----------------
def transformer_layer(h, add_mask, p):
    B, S, D = h.shape
    x2 = h.reshape(B * S, D)                              # bf16 residual stream

    # fused Q/K/V projection: one kernel, weight (768, 2304), bf16 output
    qkv = linear(x2, p["qkv_w"], p["qkv_b"])              # (B*S, 3*D) bf16
    qkv = qkv.reshape(B, S, 3 * D)                        # free metadata reshape

    ctx = attention(qkv, add_mask)                        # (B, S, D) bf16 lane-dense
    ctx2 = ctx.reshape(B * S, D)

    # out-projection + residual + post-LN fused (DistilBERT post-LN)
    sa = linear(ctx2, p["o_w"], p["o_b"],
                residual=x2, ln=(p["ln1_g"], p["ln1_b"]))

    ff = linear(sa, p["ff1_w"], p["ff1_b"], act="gelu")
    out = linear(ff, p["ff2_w"], p["ff2_b"],
                 residual=sa, ln=(p["ln2_g"], p["ln2_b"]))
    return out.reshape(B, S, D)


def distilbert_forward(params, input_ids, attention_mask):
    B, S = input_ids.shape

    # embeddings (gather stays in plain JAX glue)
    h = params["word_emb"][input_ids] + params["pos_emb"][jnp.arange(S)][None, :, :]
    h = layernorm(h.reshape(B * S, D_MODEL),
                  params["emb_ln_g"], params["emb_ln_b"]).reshape(B, S, D_MODEL)

    # additive attention mask: 0 for kept tokens, -1e9 for padding
    add_mask = (1.0 - attention_mask.astype(jnp.float32))[:, None, :] * -1e9  # (B,1,S)

    for layer_params in params["layers"]:
        h = transformer_layer(h, add_mask, layer_params)

    # classification head (matches the PyTorch module), fused into one kernel
    pooler = h[:, 0]                                       # CLS token, (B, 768) bf16
    logits = classifier_head(pooler, params["pre_w"], params["pre_b"],
                             params["cls_w"], params["cls_b"])
    return logits


# ---------------- deterministic parameter init ----------------
def init_params(key):
    std = 0.02
    keys = iter(jax.random.split(key, 16 + 8 * N_LAYERS))

    def nrm(shape, dtype=jnp.bfloat16):
        # weight matrices stored in bf16 (MXU-native, halves HBM weight traffic)
        return (std * jax.random.normal(next(keys), shape)).astype(dtype)

    params = {
        "word_emb": nrm((VOCAB, D_MODEL), jnp.float32),
        "pos_emb": nrm((MAX_POS, D_MODEL), jnp.float32),
        "emb_ln_g": jnp.ones((D_MODEL,), jnp.float32),
        "emb_ln_b": jnp.zeros((D_MODEL,), jnp.float32),
        "pre_w": nrm((D_MODEL, D_MODEL)),
        "pre_b": jnp.zeros((D_MODEL,), jnp.float32),
        "cls_w": nrm((D_MODEL, N_CLASSES)),
        "cls_b": jnp.zeros((N_CLASSES,), jnp.float32),
        "layers": [],
    }
    for _ in range(N_LAYERS):
        params["layers"].append({
            # fused [q | k | v] projection, equivalent to three (768, 768) Linears
            "qkv_w": nrm((D_MODEL, 3 * D_MODEL)),
            "qkv_b": jnp.zeros((3 * D_MODEL,), jnp.float32),
            "o_w": nrm((D_MODEL, D_MODEL)),
            "o_b": jnp.zeros((D_MODEL,), jnp.float32),
            "ln1_g": jnp.ones((D_MODEL,), jnp.float32),
            "ln1_b": jnp.zeros((D_MODEL,), jnp.float32),
            "ff1_w": nrm((D_MODEL, D_FF)),
            "ff1_b": jnp.zeros((D_FF,), jnp.float32),
            "ff2_w": nrm((D_FF, D_MODEL)),
            "ff2_b": jnp.zeros((D_MODEL,), jnp.float32),
            "ln2_g": jnp.ones((D_MODEL,), jnp.float32),
            "ln2_b": jnp.zeros((D_MODEL,), jnp.float32),
        })
    return params


if __name__ == "__main__":
    BATCH, SEQ = 2, 16
    root = jax.random.PRNGKey(0)
    k_params, k_ids = jax.random.split(root)

    params = init_params(k_params)
    input_ids = jax.random.randint(k_ids, (BATCH, SEQ), 0, VOCAB, dtype=jnp.int32)
    # second sequence has 4 padding tokens at the end
    attention_mask = jnp.ones((BATCH, SEQ), jnp.int32).at[1, -4:].set(0)

    logits = distilbert_forward(params, input_ids, attention_mask)
    jax.block_until_ready(logits)
    assert logits.shape == (BATCH, N_CLASSES) and logits.dtype == jnp.float32
    assert bool(jnp.all(jnp.isfinite(logits)))
    print("KERNEL_OK")
</pallas_src>

<mosaic_0001>
module attributes {stable_mosaic.version = 11 : i64} {
  func.func @_ln_kernel(%arg0: i32, %arg1: memref<32x768xf32, #tpu.memory_space<vmem>>, %arg2: memref<1x768xf32, #tpu.memory_space<vmem>>, %arg3: memref<1x768xf32, #tpu.memory_space<vmem>>, %arg4: memref<32x768xbf16, #tpu.memory_space<vmem>>) attributes {dimension_semantics = [#tpu.dimension_semantics<arbitrary>], iteration_bounds = array<i64: 1>, scalar_prefetch = 0 : i64, scratch_operands = 0 : i64, tpu.core_type = #tpu.core_type<tc>, window_params = [{pipeline_mode = #tpu.pipeline_mode<synchronous>, transform_indices = @transform_0, window_bounds = array<i64: 32, 768>}, {pipeline_mode = #tpu.pipeline_mode<synchronous>, transform_indices = @transform_1, window_bounds = array<i64: 1, 768>}, {pipeline_mode = #tpu.pipeline_mode<synchronous>, transform_indices = @transform_2, window_bounds = array<i64: 1, 768>}, {pipeline_mode = #tpu.pipeline_mode<synchronous>, transform_indices = @transform_3, window_bounds = array<i64: 32, 768>}]} {
    %c0 = arith.constant 0 : index
    %c0_0 = arith.constant 0 : index
    %0 = vector.load %arg1[%c0, %c0_0] : memref<32x768xf32, #tpu.memory_space<vmem>>, vector<32x768xf32>
    %cst = arith.constant dense<0.000000e+00> : vector<32xf32>
    %1 = vector.multi_reduction <add>, %0, %cst [1] : vector<32x768xf32> to vector<32xf32>
    %2 = vector.shape_cast %1 : vector<32xf32> to vector<32x1xf32>
    %cst_1 = arith.constant 7.680000e+02 : f32
    %3 = vector.broadcast %cst_1 : f32 to vector<32x1xf32>
    %4 = arith.divf %2, %3 : vector<32x1xf32>
    %5 = vector.broadcast %4 : vector<32x1xf32> to vector<32x768xf32>
    %6 = arith.subf %0, %5 : vector<32x768xf32>
    %7 = arith.mulf %6, %6 : vector<32x768xf32>
    %cst_2 = arith.constant dense<0.000000e+00> : vector<32xf32>
    %8 = vector.multi_reduction <add>, %7, %cst_2 [1] : vector<32x768xf32> to vector<32xf32>
    %9 = vector.shape_cast %8 : vector<32xf32> to vector<32x1xf32>
    %cst_3 = arith.constant 7.680000e+02 : f32
    %10 = vector.broadcast %cst_3 : f32 to vector<32x1xf32>
    %11 = arith.divf %9, %10 : vector<32x1xf32>
    %12 = vector.broadcast %4 : vector<32x1xf32> to vector<32x768xf32>
    %13 = arith.subf %0, %12 : vector<32x768xf32>
    %cst_4 = arith.constant 9.99999996E-13 : f32
    %14 = vector.broadcast %cst_4 : f32 to vector<32x1xf32>
    %15 = arith.addf %11, %14 : vector<32x1xf32>
    %16 = math.rsqrt %15 : vector<32x1xf32>
    %17 = vector.broadcast %16 : vector<32x1xf32> to vector<32x768xf32>
    %18 = arith.mulf %13, %17 : vector<32x768xf32>
    %c0_5 = arith.constant 0 : index
    %c0_6 = arith.constant 0 : index
    %19 = vector.load %arg2[%c0_5, %c0_6] : memref<1x768xf32, #tpu.memory_space<vmem>>, vector<1x768xf32>
    %20 = vector.broadcast %19 : vector<1x768xf32> to vector<32x768xf32>
    %21 = arith.mulf %18, %20 : vector<32x768xf32>
    %c0_7 = arith.constant 0 : index
    %c0_8 = arith.constant 0 : index
    %22 = vector.load %arg3[%c0_7, %c0_8] : memref<1x768xf32, #tpu.memory_space<vmem>>, vector<1x768xf32>
    %23 = vector.broadcast %22 : vector<1x768xf32> to vector<32x768xf32>
    %24 = arith.addf %21, %23 : vector<32x768xf32>
    %25 = arith.truncf %24 : vector<32x768xf32> to vector<32x768xbf16>
    %c0_9 = arith.constant 0 : index
    %c0_10 = arith.constant 0 : index
    %26 = vector.load %arg4[%c0_9, %c0_10] : memref<32x768xbf16, #tpu.memory_space<vmem>>, vector<32x768xbf16>
    tpu.vector_store %arg4[%c0_9, %c0_10], %25 {strides = array<i32>} : memref<32x768xbf16, #tpu.memory_space<vmem>>, vector<32x768xbf16>,
    return
  }
  func.func @transform_0(%arg0: i32) -> (i32, i32) {
    %c0_i32 = arith.constant 0 : i32
    %c0_i32_0 = arith.constant 0 : i32
    %c0_i32_1 = arith.constant 0 : i32
    return %c0_i32, %c0_i32_0 : i32, i32
  }
  func.func @transform_1(%arg0: i32) -> (i32, i32) {
    %c0_i32 = arith.constant 0 : i32
    %c0_i32_0 = arith.constant 0 : i32
    %c0_i32_1 = arith.constant 0 : i32
    return %c0_i32, %c0_i32_0 : i32, i32
  }
  func.func @transform_2(%arg0: i32) -> (i32, i32) {
    %c0_i32 = arith.constant 0 : i32
    %c0_i32_0 = arith.constant 0 : i32
    %c0_i32_1 = arith.constant 0 : i32
    return %c0_i32, %c0_i32_0 : i32, i32
  }
  func.func @transform_3(%arg0: i32) -> (i32, i32) {
    %c0_i32 = arith.constant 0 : i32
    %c0_i32_0 = arith.constant 0 : i32
    %c0_i32_1 = arith.constant 0 : i32
    return %c0_i32, %c0_i32_0 : i32, i32
  }
}

</mosaic_0001>

<bundles_post_ra>
// kernel: tpu_custom_call.1
= control target key start
LH: loop header
LB: loop body
LE: loop exit
PB: predicated region body
PF: predicated region fallthrough
CT: control target
= control target key end

     0   :  { %8 = vsyncpa [#allocation3], 0  ;;  %s781_s0 = inlined_call_operand.hbm [shape: f32[32,768], index: 0, kind: input, shape index: {}]   ;;  %s782_s1 = inlined_call_operand.hbm [shape: f32[1,768], index: 1, kind: input, shape index: {}]   ;;  %s783_s2 = inlined_call_operand.vmem [shape: f32[1,768], index: 2, kind: input, shape index: {}]   ;;  %s784_s3 = inlined_call_operand.hbm [shape: bf16[32,768], index: 3, kind: output, shape index: {}]  }
   0x1   :  { %9 = vsyncpa [#allocation6], 0 }
   0x2   :  { %10 = vsyncpa [#allocation4], 0  ;;  %s535_s12 = smov [#allocation2]   ;;  %s463_s16 = scalar_lea.hbm %s781_s0, 3072 }
   0x3   :  { %s16_s13 = sshll.u32 %s535_s12, 4  ;;  %p464_p0 = scmp.ne.s32.totalorder %s781_s0, %s463_s16  ;;  %s17_s13 = int_to_ptr.vmem [resolvable:$true] %s16_s13 }
   0x4   :  { %p467_p1 = scmp.lt.u32.totalorder %s463_s16, %s781_s0 }
   0x6   :  { %p469_p2 = pnand %p467_p1, %p464_p0 }
   0x8   :  { %472 = shalt.err (!%p469_p2)
}
   0x9   :  { %s473_s21 = scalar_lea.vmem %s17_s13, 3072  ;;  %p478_p4 = scmp.lt.s32.totalorder %s17_s13, %s17_s13 }
   0xa   :  { %p474_p3 = scmp.ne.s32.totalorder %s17_s13, %s473_s21  ;;  %p479_p5 = scmp.lt.s32.totalorder %s473_s21, %s473_s21 }
   0xc   :  { %p480_p6 = por %p479_p5, %p478_p4 }
   0xe   :  { %p481_p7 = pnand %p480_p6, %p474_p3 }
  0x10   :  { %484 = shalt.err (!%p481_p7)
}
  0x11   :  { %s536_s22 = smov 768   ;;  %s537_s23 = smov 48  }
  0x12   :  { %22 = dma.hbm_to_vmem [thread:$0]  %s781_s0, 3072, %s17_s13, [#allocation3], %s536_s22, %s536_s22, %s537_s23  }
  0x13   :  { %s538_s26 = smov [#allocation5]   ;;  %s485_s30 = scalar_lea.hbm %s782_s1, 96 }
  0x14   :  { %s29_s27 = sshll.u32 %s538_s26, 4  ;;  %p486_p8 = scmp.ne.s32.totalorder %s782_s1, %s485_s30  ;;  %s30_s27 = int_to_ptr.vmem [resolvable:$true] %s29_s27 }
  0x15   :  { %p489_p9 = scmp.lt.u32.totalorder %s485_s30, %s782_s1 }
  0x17   :  { %p491_p10 = pnand %p489_p9, %p486_p8 }
  0x19   :  { %494 = shalt.err (!%p491_p10)
}
  0x1a   :  { %s495_s8 = scalar_lea.vmem %s30_s27, 96  ;;  %p500_p12 = scmp.lt.s32.totalorder %s30_s27, %s30_s27 }
  0x1b   :  { %p496_p11 = scmp.ne.s32.totalorder %s30_s27, %s495_s8  ;;  %p501_p13 = scmp.lt.s32.totalorder %s495_s8, %s495_s8 }
  0x1d   :  { %p502_p0 = por %p501_p13, %p500_p12 }
  0x1f   :  { %p503_p1 = pnand %p502_p0, %p496_p11 }
  0x21   :  { %506 = shalt.err (!%p503_p1)
}
  0x22   :  { %32 = dma.hbm_to_vmem [thread:$0]  %s782_s1, 96, %s30_s27, [#allocation6]  }
  0x23   :  { %529 = dma.done.wait [#allocation3], 3072  }
  0x24   :  { %530 = vsyncadd [#allocation3], 4294964224 }
  0x25   :  { %531 = dma.done.wait [#allocation6], 96  }
  0x26   :  { %532 = vsyncadd [#allocation6], 4294967200  ;;  %v53_v0 = vld [vmem:[#allocation2 + $0x60] sm:$0xff]  ;;  %v54_v1 = vld [vmem:[#allocation2 + $0x68] sm:$0xff] }
  0x27   :  { %v55_v2 = vld [vmem:[#allocation2 + $0x70] sm:$0xff]  ;;  %v56_v3 = vld [vmem:[#allocation2 + $0x78] sm:$0xff]  ;;  %v79_v4 = vadd.f32 %v54_v1, %v53_v0  ;;  %v41_v5 = vld [vmem:[#allocation2] sm:$0xff] }
  0x28   :  { %v42_v6 = vld [vmem:[#allocation2 + $0x8] sm:$0xff]  ;;  %v43_v7 = vld [vmem:[#allocation2 + $0x10] sm:$0xff]  ;;  %v57_v8 = vld [vmem:[#allocation2 + $0x80] sm:$0xff] }
  0x29   :  { %v80_v9 = vadd.f32 %v79_v4, %v55_v2  ;;  %v44_v10 = vld [vmem:[#allocation2 + $0x18] sm:$0xff]  ;;  %v65_v11 = vadd.f32 %v42_v6, %v41_v5  ;;  %v586_v12 = vld [vmem:[#allocation2 + $0x90] sm:$0xff]  ;;  %v590_v14 = vld [vmem:[#allocation2 + $0xa0] sm:$0xff] }
  0x2a   :  { %v588_v13 = vld [vmem:[#allocation2 + $0x98] sm:$0xff]  ;;  %v58_v15 = vld [vmem:[#allocation2 + $0x88] sm:$0xff]  ;;  %v45_v17 = vld [vmem:[#allocation2 + $0x20] sm:$0xff] }
  0x2b   :  { %v81_v16 = vadd.f32 %v80_v9, %v56_v3  ;;  %v66_v18 = vadd.f32 %v65_v11, %v43_v7  ;;  %v592_v19 = vld [vmem:[#allocation2 + $0xa8] sm:$0xff]  ;;  %v86_v20 = vadd.f32 %v588_v13, %v586_v12  ;;  %v47_v21 = vld [vmem:[#allocation2 + $0x30] sm:$0xff]  ;;  %v48_v22 = vld [vmem:[#allocation2 + $0x38] sm:$0xff] }
  0x2c   :  { %v49_v23 = vld [vmem:[#allocation2 + $0x40] sm:$0xff]  ;;  %v72_v27 = vadd.f32 %v48_v22, %v47_v21  ;;  %v46_v28 = vld [vmem:[#allocation2 + $0x28] sm:$0xff]  ;;  %v597_v29 = vld [vmem:[#allocation2 + $0xb0] sm:$0xff] }
  0x2d   :  { %v82_v24 = vadd.f32 %v81_v16, %v57_v8  ;;  %v67_v25 = vadd.f32 %v66_v18, %v44_v10  ;;  %v87_v26 = vadd.f32 %v86_v20, %v590_v14  ;;  %v50_v30 = vld [vmem:[#allocation2 + $0x48] sm:$0xff]  ;;  %v600_v35 = vld [vmem:[#allocation2 + $0xb8] sm:$0xff]  ;;  %v51_v36 = vld [vmem:[#allocation2 + $0x50] sm:$0xff] }
  0x2e   :  { %v73_v34 = vadd.f32 %v72_v27, %v49_v23  ;;  %v52_v40 = vld [vmem:[#allocation2 + $0x58] sm:$0xff] }
  0x2f   :  { %v83_v31 = vadd.f32 %v82_v24, %v58_v15  ;;  %v68_v32 = vadd.f32 %v67_v25, %v45_v17  ;;  %v88_v33 = vadd.f32 %v87_v26, %v592_v19 }
  0x30   :  { %v74_v39 = vadd.f32 %v73_v34, %v50_v30 }
  0x31   :  { %84 = vadd.xlane.f32.xlu1 %v83_v31  ;;  %v69_v37 = vadd.f32 %v68_v32, %v46_v28  ;;  %v89_v38 = vadd.f32 %v88_v33, %v597_v29 }
  0x32   :  { %v75_v42 = vadd.f32 %v74_v39, %v51_v36 }
  0x33   :  { %70 = vadd.xlane.f32.xlu0 %v69_v37  ;;  %v90_v41 = vadd.f32 %v89_v38, %v600_v35 }
  0x34   :  { %v76_v43 = vadd.f32 %v75_v42, %v52_v40 }
  0x35   :  { %91 = vadd.xlane.f32.xlu1 %v90_v41 }
  0x37   :  { %77 = vadd.xlane.f32.xlu0 %v76_v43 }
  0xbe   :  { %v85_v44 = vpop.xlane.xlu1 %84 }
  0xbf   :  { %v96_v45 = vmul.f32 0.0013020834, %v85_v44 }
  0xc0   :  { %v71_v46 = vpop.xlane.xlu0 %70 }
  0xc1   :  { %v94_v47 = vmul.f32 0.0013020834, %v71_v46  ;;  %v604_v48 = vsub.f32 %v53_v0, %v96_v45  ;;  %v606_v49 = vsub.f32 %v54_v1, %v96_v45  ;;  %v614_v54 = vsub.f32 %v55_v2, %v96_v45 }
  0xc2   :  { %v92_v50 = vpop.xlane.xlu1 %91  ;;  %v618_v57 = vsub.f32 %v56_v3, %v96_v45  ;;  %v628_v0 = vsub.f32 %v57_v8, %v96_v45  ;;  %v630_v1 = vsub.f32 %v58_v15, %v96_v45 }
  0xc3   :  { %v608_v51 = vsub.f32 %v41_v5, %v94_v47  ;;  %v610_v52 = vsub.f32 %v42_v6, %v94_v47  ;;  %v612_v53 = vsub.f32 %v43_v7, %v94_v47  ;;  %v616_v56 = vsub.f32 %v44_v10, %v94_v47 }
  0xc4   :  { %v78_v55 = vpop.xlane.xlu0 %77  ;;  %v134_v58 = vmul.f32 %v604_v48, %v604_v48  ;;  %v622_v60 = vsub.f32 %v45_v17, %v94_v47  ;;  %v97_v63 = vmul.f32 0.0013020834, %v92_v50  ;;  %v135_v2 = vmul.f32 %v606_v49, %v606_v49 }
  0xc5   :  { %v95_v59 = vmul.f32 0.0013020834, %v78_v55  ;;  %v122_v61 = vmul.f32 %v608_v51, %v608_v51  ;;  %v123_v62 = vmul.f32 %v610_v52, %v610_v52  ;;  %v634_v3 = vsub.f32 %v46_v28, %v94_v47 }
  0xc6   :  { %v124_v4 = vmul.f32 %v612_v53, %v612_v53  ;;  %v136_v6 = vmul.f32 %v614_v54, %v614_v54  ;;  %v137_v7 = vmul.f32 %v618_v57, %v618_v57  ;;  %v160_v9 = vadd.f32 %v135_v2, %v134_v58 }
  0xc7   :  { %v146_v5 = vadd.f32 %v123_v62, %v122_v61  ;;  %v642_v8 = vsub.f32 %v47_v21, %v95_v59  ;;  %v644_v10 = vsub.f32 %v48_v22, %v95_v59  ;;  %v125_v11 = vmul.f32 %v616_v56, %v616_v56 }
  0xc8   :  { %v126_v15 = vmul.f32 %v622_v60, %v622_v60  ;;  %v650_v17 = vsub.f32 %v49_v23, %v95_v59  ;;  %v161_v18 = vadd.f32 %v160_v9, %v136_v6  ;;  %v652_v20 = vsub.f32 %v50_v30, %v95_v59 }
  0xc9   :  { %v147_v16 = vadd.f32 %v146_v5, %v124_v4  ;;  %v128_v24 = vmul.f32 %v642_v8, %v642_v8  ;;  %v129_v21 = vmul.f32 %v644_v10, %v644_v10  ;;  %v127_v22 = vmul.f32 %v634_v3, %v634_v3 }
  0xca   :  { %v138_v26 = vmul.f32 %v628_v0, %v628_v0  ;;  %v662_v27 = vsub.f32 %v51_v36, %v95_v59  ;;  %v162_v23 = vadd.f32 %v161_v18, %v137_v7  ;;  %v130_v28 = vmul.f32 %v650_v17, %v650_v17 }
  0xcb   :  { %v148_v25 = vadd.f32 %v147_v16, %v125_v11  ;;  %v153_v30 = vadd.f32 %v129_v21, %v128_v24  ;;  %v667_v31 = vsub.f32 %v586_v12, %v97_v63  ;;  %v670_v33 = vsub.f32 %v588_v13, %v97_v63 }
  0xcc   :  { %v673_v34 = vsub.f32 %v590_v14, %v97_v63  ;;  %v676_v37 = vsub.f32 %v592_v19, %v97_v63  ;;  %v163_v36 = vadd.f32 %v162_v23, %v138_v26  ;;  %v678_v38 = vsub.f32 %v52_v40, %v95_v59  ;;  %v210_v23 = vld [vmem:[#allocation5] sm:$0x3f] }
  0xcd   :  { %v149_v32 = vadd.f32 %v148_v25, %v126_v15  ;;  %v131_v39 = vmul.f32 %v652_v20, %v652_v20  ;;  %v154_v41 = vadd.f32 %v153_v30, %v130_v28  ;;  %v140_v12 = vmul.f32 %v667_v31, %v667_v31 }
  0xce   :  { %v141_v13 = vmul.f32 %v670_v33, %v670_v33  ;;  %v142_v14 = vmul.f32 %v673_v34, %v673_v34  ;;  %v132_v19 = vmul.f32 %v662_v27, %v662_v27  ;;  %v139_v40 = vmul.f32 %v630_v1, %v630_v1 }
  0xcf   :  { %v150_v42 = vadd.f32 %v149_v32, %v127_v22  ;;  %v155_v43 = vadd.f32 %v154_v41, %v131_v39  ;;  %v693_v44 = vsub.f32 %v597_v29, %v97_v63  ;;  %v143_v45 = vmul.f32 %v676_v37, %v676_v37  ;;  %v266_v41 = vld [vmem:[%s783_s2] sm:$0x3f]  ;;  %s539_s2 = smov [#allocation7]  }
  0xd0   :  { %v167_v46 = vadd.f32 %v141_v13, %v140_v12  ;;  %v133_v47 = vmul.f32 %v678_v38, %v678_v38  ;;  %v164_v55 = vadd.f32 %v163_v36, %v139_v40  ;;  %v700_v58 = vsub.f32 %v600_v35, %v97_v63  ;;  %s411_s11 = sshll.u32 %s539_s2, 4  ;;  %s412_s11 = int_to_ptr.vmem [resolvable:$true] %s411_s11 }
  0xd1   :  { %151 = vadd.xlane.f32.xlu0 %v150_v42  ;;  %v156_v50 = vadd.f32 %v155_v43, %v132_v19  ;;  %v144_v62 = vmul.f32 %v693_v44, %v693_v44  ;;  %v212_v9 = vlaneseq  ;;  %s507_s12 = scalar_lea.vmem %s412_s11, 1536  ;;  %p512_p3 = scmp.lt.s32.totalorder %s412_s11, %s412_s11 }
  0xd2   :  { %v168_v59 = vadd.f32 %v167_v46, %v142_v14  ;;  %v145_v2 = vmul.f32 %v700_v58, %v700_v58  ;;  %p508_p2 = scmp.ne.s32.totalorder %s412_s11, %s507_s12  ;;  %p513_p4 = scmp.lt.s32.totalorder %s507_s12, %s507_s12 }
  0xd3   :  { %v157_v61 = vadd.f32 %v156_v50, %v133_v47  ;;  %v213_v16 = vshrl.u32 %v212_v9, 7 }
  0xd4   :  { %v169_v29 = vadd.f32 %v168_v59, %v143_v45  ;;  %p514_p5 = por %p513_p4, %p512_p3 }
  0xd5   :  { %165 = vadd.xlane.f32.xlu0 %v164_v55  ;;  %158 = vadd.xlane.f32.xlu1 %v157_v61  ;;  %v214_v22 = vsub.s32 0, %v213_v16  ;;  %v218_v25 = vsub.s32 1, %v213_v16  ;;  %v222_v28 = vsub.s32 2, %v213_v16  ;;  %v226_v30 = vsub.s32 3, %v213_v16 }
  0xd6   :  { %v170_v4 = vadd.f32 %v169_v29, %v144_v62  ;;  %v230_v32 = vsub.s32 4, %v213_v16  ;;  %v234_v39 = vsub.s32 5, %v213_v16  ;;  %p515_p6 = pnand %p514_p5, %p508_p2 }
  0xd7   :  { %v215_v12 = vrot.slane %v210_v23, %v214_v22  ;;  %v219_v13 = vrot.slane %v210_v23, %v218_v25  ;;  %v223_v14 = vrot.slane %v210_v23, %v222_v28  ;;  %v227_v19 = vrot.slane %v210_v23, %v226_v30 }
  0xd8   :  { %v171_v5 = vadd.f32 %v170_v4, %v145_v2  ;;  %v231_v43 = vrot.slane %v210_v23, %v230_v32  ;;  %v235_v45 = vrot.slane %v210_v23, %v234_v39  ;;  %v709_v46 = vrot.slane %v266_v41, %v214_v22 }
  0xd9   :  { %v711_v47 = vrot.slane %v266_v41, %v218_v25  ;;  %v719_v2 = vrot.slane %v266_v41, %v222_v28  ;;  %v721_v4 = vrot.slane %v266_v41, %v226_v30  ;;  %v725_v9 = vrot.slane %v266_v41, %v234_v39 }
  0xda   :  { %172 = vadd.xlane.f32.xlu1 %v171_v5 }
 0x15e   :  { %v152_v6 = vpop.xlane.xlu0 %151 }
 0x15f   :  { %v174_v7 = vmul.f32 0.0013020834, %v152_v6 }
 0x161   :  { %v178_v11 = vadd.f32 1e-12, %v174_v7  ;;  %v723_v7 = vrot.slane %v266_v41, %v230_v32 }
 0x162   :  { %v166_v35 = vpop.xlane.xlu0 %165  ;;  %v159_v63 = vpop.xlane.xlu1 %158 }
 0x163   :  { %455 = vrsqrt.f32 %v178_v11  ;;  %v176_v15 = vmul.f32 0.0013020834, %v166_v35  ;;  %v175_v18 = vmul.f32 0.0013020834, %v159_v63 }
 0x165   :  { %v180_v24 = vadd.f32 1e-12, %v176_v15  ;;  %v179_v21 = vadd.f32 1e-12, %v175_v18 }
 0x167   :  { %457 = vrsqrt.f32 %v180_v24  ;;  %v173_v26 = vpop.xlane.xlu1 %172 }
 0x168   :  { %459 = vrsqrt.f32 %v179_v21  ;;  %v177_v36 = vmul.f32 0.0013020834, %v173_v26 }
 0x16a   :  { %v181_v42 = vadd.f32 1e-12, %v177_v36 }
 0x16c   :  { %461 = vrsqrt.f32 %v181_v42 }
 0x16d   :  { %v456_v40 = vpop.eup %455 }
 0x16e   :  { %v186_v50 = vmul.f32 %v456_v40, %v608_v51  ;;  %v187_v55 = vmul.f32 %v456_v40, %v610_v52  ;;  %v188_v59 = vmul.f32 %v456_v40, %v612_v53  ;;  %v189_v61 = vmul.f32 %v456_v40, %v616_v56 }
 0x16f   :  { %v190_v62 = vmul.f32 %v456_v40, %v622_v60  ;;  %v191_v29 = vmul.f32 %v456_v40, %v634_v3 }
 0x170   :  { %v242_v5 = vmul.f32 %v215_v12, %v186_v50  ;;  %v243_v6 = vmul.f32 %v219_v13, %v187_v55  ;;  %v244_v52 = vmul.f32 %v223_v14, %v188_v59  ;;  %v245_v11 = vmul.f32 %v227_v19, %v189_v61 }
 0x171   :  { %v458_v51 = vpop.eup %457  ;;  %v246_v53 = vmul.f32 %v231_v43, %v190_v62  ;;  %v247_v35 = vmul.f32 %v235_v45, %v191_v29 }
 0x172   :  { %v460_v56 = vpop.eup %459  ;;  %v198_v60 = vmul.f32 %v458_v51, %v604_v48  ;;  %v199_v3 = vmul.f32 %v458_v51, %v606_v49  ;;  %v200_v63 = vmul.f32 %v458_v51, %v614_v54  ;;  %v201_v15 = vmul.f32 %v458_v51, %v618_v57 }
 0x173   :  { %v192_v16 = vmul.f32 %v460_v56, %v642_v8  ;;  %v193_v18 = vmul.f32 %v460_v56, %v644_v10  ;;  %v194_v24 = vmul.f32 %v460_v56, %v650_v17  ;;  %v195_v21 = vmul.f32 %v460_v56, %v652_v20 }
 0x174   :  { %v196_v22 = vmul.f32 %v460_v56, %v662_v27  ;;  %v197_v25 = vmul.f32 %v460_v56, %v678_v38  ;;  %v202_v48 = vmul.f32 %v458_v51, %v628_v0  ;;  %v203_v49 = vmul.f32 %v458_v51, %v630_v1 }
 0x175   :  { %v248_v26 = vmul.f32 %v215_v12, %v192_v16  ;;  %v249_v54 = vmul.f32 %v219_v13, %v193_v18  ;;  %v250_v23 = vmul.f32 %v223_v14, %v194_v24  ;;  %v251_v57 = vmul.f32 %v227_v19, %v195_v21 }
 0x176   :  { %v252_v28 = vmul.f32 %v231_v43, %v196_v22  ;;  %v253_v8 = vmul.f32 %v235_v45, %v197_v25  ;;  %v254_v30 = vmul.f32 %v215_v12, %v198_v60  ;;  %v255_v10 = vmul.f32 %v219_v13, %v199_v3  ;;  %v462_v32 = vpop.eup %461 }
 0x177   :  { %v256_v17 = vmul.f32 %v223_v14, %v200_v63  ;;  %v257_v36 = vmul.f32 %v227_v19, %v201_v15  ;;  %v258_v20 = vmul.f32 %v231_v43, %v202_v48  ;;  %v259_v39 = vmul.f32 %v235_v45, %v203_v49 }
 0x178   :  { %v204_v27 = vmul.f32 %v462_v32, %v667_v31  ;;  %v205_v38 = vmul.f32 %v462_v32, %v670_v33  ;;  %v206_v0 = vmul.f32 %v462_v32, %v673_v34  ;;  %v207_v1 = vmul.f32 %v462_v32, %v676_v37 }
 0x179   :  { %v208_v41 = vmul.f32 %v462_v32, %v693_v44  ;;  %v209_v42 = vmul.f32 %v462_v32, %v700_v58  ;;  %v298_v40 = vadd.f32 %v709_v46, %v242_v5  ;;  %v299_v50 = vadd.f32 %v711_v47, %v243_v6 }
 0x17a   :  { %v260_v55 = vmul.f32 %v215_v12, %v204_v27  ;;  %v261_v59 = vmul.f32 %v219_v13, %v205_v38  ;;  %v262_v61 = vmul.f32 %v223_v14, %v206_v0  ;;  %v263_v62 = vmul.f32 %v227_v19, %v207_v1 }
 0x17b   :  { %v264_v29 = vmul.f32 %v231_v43, %v208_v41  ;;  %v265_v31 = vmul.f32 %v235_v45, %v209_v42  ;;  %v300_v33 = vadd.f32 %v719_v2, %v244_v52  ;;  %v301_v34 = vadd.f32 %v721_v4, %v245_v11 }
 0x17c   :  { %v302_v37 = vadd.f32 %v723_v7, %v246_v53  ;;  %v303_v44 = vadd.f32 %v725_v9, %v247_v35  ;;  %v304_v58 = vadd.f32 %v709_v46, %v248_v26  ;;  %v305_v5 = vadd.f32 %v711_v47, %v249_v54 }
 0x17d   :  { %v306_v6 = vadd.f32 %v719_v2, %v250_v23  ;;  %v307_v12 = vadd.f32 %v721_v4, %v251_v57  ;;  %v308_v13 = vadd.f32 %v723_v7, %v252_v28  ;;  %v309_v14 = vadd.f32 %v725_v9, %v253_v8 }
 0x17e   :  { %v310_v19 = vadd.f32 %v709_v46, %v254_v30  ;;  %v311_v43 = vadd.f32 %v711_v47, %v255_v10  ;;  %v312_v45 = vadd.f32 %v719_v2, %v256_v17  ;;  %v313_v51 = vadd.f32 %v721_v4, %v257_v36 }
 0x17f   :  { %v314_v52 = vadd.f32 %v723_v7, %v258_v20  ;;  %v315_v11 = vadd.f32 %v725_v9, %v259_v39  ;;  %v316_v53 = vadd.f32 %v709_v46, %v260_v55  ;;  %v317_v35 = vadd.f32 %v711_v47, %v261_v59 }
 0x180   :  { %v318_v56 = vadd.f32 %v719_v2, %v262_v61  ;;  %v319_v60 = vadd.f32 %v721_v4, %v263_v62  ;;  %v320_v3 = vadd.f32 %v723_v7, %v264_v29  ;;  %v321_v63 = vadd.f32 %v725_v9, %v265_v31 }
 0x181   :  { %v436_v15 = vpack.c.bf16 %v299_v50, %v298_v40  ;;  %v437_v16 = vpack.c.bf16 %v301_v34, %v300_v33  ;;  %v438_v18 = vpack.c.bf16 %v303_v44, %v302_v37  ;;  %v439_v24 = vpack.c.bf16 %v305_v5, %v304_v58 }
 0x182   :  { %v440_v21 = vpack.c.bf16 %v307_v12, %v306_v6  ;;  %v441_v22 = vpack.c.bf16 %v309_v14, %v308_v13  ;;  %v442_v25 = vpack.c.bf16 %v311_v43, %v310_v19  ;;  %v443_v46 = vpack.c.bf16 %v313_v51, %v312_v45 }
 0x183   :  { %v444_v48 = vpack.c.bf16 %v315_v11, %v314_v52  ;;  %v445_v47 = vpack.c.bf16 %v317_v35, %v316_v53  ;;  %v446_v49 = vpack.c.bf16 %v319_v60, %v318_v56  ;;  %v447_v2 = vpack.c.bf16 %v321_v63, %v320_v3  ;;  %394 = vst [vmem:[#allocation7] sm:$0xff] %v436_v15 }
 0x184   :  { %395 = vst [vmem:[#allocation7 + $0x8] sm:$0xff] %v437_v16  ;;  %396 = vst [vmem:[#allocation7 + $0x10] sm:$0xff] %v438_v18 }
 0x185   :  { %397 = vst [vmem:[#allocation7 + $0x18] sm:$0xff] %v439_v24  ;;  %398 = vst [vmem:[#allocation7 + $0x20] sm:$0xff] %v440_v21 }
 0x186   :  { %399 = vst [vmem:[#allocation7 + $0x28] sm:$0xff] %v441_v22  ;;  %400 = vst [vmem:[#allocation7 + $0x30] sm:$0xff] %v442_v25 }
 0x187   :  { %401 = vst [vmem:[#allocation7 + $0x38] sm:$0xff] %v443_v46  ;;  %402 = vst [vmem:[#allocation7 + $0x40] sm:$0xff] %v444_v48 }
 0x188   :  { %403 = vst [vmem:[#allocation7 + $0x48] sm:$0xff] %v445_v47  ;;  %404 = vst [vmem:[#allocation7 + $0x50] sm:$0xff] %v446_v49 }
 0x189   :  { %405 = vst [vmem:[#allocation7 + $0x58] sm:$0xff] %v447_v2 }
 0x18a   :  { %518 = shalt.err (!%p515_p6)
}
 0x18b   :  { %s519_s15 = scalar_lea.hbm %s784_s3, 1536 }
 0x18c   :  { %p520_p7 = scmp.ne.s32.totalorder %s784_s3, %s519_s15  ;;  %p523_p8 = scmp.lt.u32.totalorder %s519_s15, %s784_s3 }
 0x18e   :  { %p525_p9 = pnand %p523_p8, %p520_p7 }
 0x190   :  { %528 = shalt.err (!%p525_p9)
}
 0x191   :  { %s540_s20 = smov 384   ;;  %s541_s21 = smov 24  }
 0x192   :  { %417 = dma.vmem_to_hbm [thread:$0]  %s412_s11, 1536, %s784_s3, [#allocation4], %s540_s20, %s540_s20, %s541_s21  }
 0x193   :  { %533 = dma.done.wait [#allocation4], 1536  }
 0x194   :  { %534 = vsyncadd [#allocation4], 4294965760 }
 0x195   :  { %421 = vsyncpa [#allocation3], 1 }
 0x196   :  { %422 = vsyncpa [#allocation6], 1 }
 0x197   :  { %423 = vsyncpa [#allocation4], 1 }

</bundles_post_ra>
